<compile_context>
chip_gen: v7x
topology: tpu7x:2x2x1
jax: 0.10.0
libtpu: 0.0.40
codegen_flags: <defaults>
</compile_context>

<pallas_src>
import jax
import jax.numpy as jnp
from jax.experimental import pallas as pl
from jax.experimental.pallas import tpu as pltpu


def _round_up(x, m):
    return (x + m - 1) // m * m


def _pick_seq_tile(S):
    # Prefer large, (8,128)-aligned sequence tiles; fall back to full S for
    # small sequences (block == full dim is always legal).
    for ts in (512, 256, 128):
        if S % ts == 0 and S >= ts:
            return ts
    return S


# ---------------------------------------------------------------------------
# Pass 1: per-batch subject correction row.
#   sub[b]   = 0.5 * (subj_head_map[b] + subj_tail_map[b]) @ hidden[b]   (1, H)
#   corr[b]  = sub[b] @ W_corr + bias_full                               (1, Npad)
# W_corr is the fused weight with the two subject columns zeroed (the subject
# logits are computed on `hidden`, not `hidden + sub`).
# ---------------------------------------------------------------------------
def _subject_corr_kernel(shm_ref, stm_ref, hid_ref, wcorr_ref, bias_ref,
                         corr_ref, acc_ref):
    s = pl.program_id(1)

    @pl.when(s == 0)
    def _():
        acc_ref[...] = jnp.zeros_like(acc_ref)

    m = (shm_ref[0] + stm_ref[0]).astype(jnp.float32)            # (1, ts)
    h = hid_ref[0].astype(jnp.float32)                            # (ts, H)
    acc_ref[...] += jnp.dot(m, h, preferred_element_type=jnp.float32)

    @pl.when(s == pl.num_programs(1) - 1)
    def _():
        sub = acc_ref[...] * 0.5                                  # (1, H)
        corr = jnp.dot(sub, wcorr_ref[...].astype(jnp.float32),
                       preferred_element_type=jnp.float32)
        corr = corr + bias_ref[...].astype(jnp.float32)           # (1, Npad)
        corr_ref[0] = corr.astype(corr_ref.dtype)


# ---------------------------------------------------------------------------
# Pass 2: fused lane-dense projection.
#   out[b, s_tile] = hidden[b, s_tile] @ W_fused + corr[b]
# Columns of the (padded) output slab:
#   [0]          subj_head logits
#   [1]          subj_tail logits
#   [2 : 2+C]    obj_head logits
#   [2+C : 2+2C] obj_tail logits
# ---------------------------------------------------------------------------
def _fused_projection_kernel(hid_ref, wfused_ref, corr_ref, out_ref):
    h = hid_ref[0].astype(jnp.float32)                            # (ts, H)
    w = wfused_ref[...].astype(jnp.float32)                       # (H, Npad)
    out = jnp.dot(h, w, preferred_element_type=jnp.float32)       # (ts, Npad)
    out = out + corr_ref[0].astype(jnp.float32)                   # (1, Npad) bcast
    out_ref[0] = out.astype(out_ref.dtype)


def subj_obj_span_forward(hidden, subj_head, subj_tail, params,
                          compute_dtype=jnp.float32):
    """Pallas forward. params uses PyTorch Linear layout: w_* (out, H), b_* (out,)."""
    B, S, H = hidden.shape
    C = params['w_oh'].shape[0]
    n_cols = 2 + 2 * C
    n_pad = _round_up(max(n_cols, 128), 128)
    ts = _pick_seq_tile(S)
    assert S % ts == 0

    # --- build fused weight / bias (one-time layout plumbing in the wrapper)
    w_fused = jnp.zeros((H, n_pad), jnp.float32)
    w_fused = w_fused.at[:, 0].set(params['w_sh'][0])
    w_fused = w_fused.at[:, 1].set(params['w_st'][0])
    w_fused = w_fused.at[:, 2:2 + C].set(params['w_oh'].T)
    w_fused = w_fused.at[:, 2 + C:2 + 2 * C].set(params['w_ot'].T)
    # subject-vector correction only feeds the object columns
    w_corr = w_fused.at[:, 0].set(0.0).at[:, 1].set(0.0)

    bias = jnp.zeros((1, n_pad), jnp.float32)
    bias = bias.at[0, 0].set(params['b_sh'][0])
    bias = bias.at[0, 1].set(params['b_st'][0])
    bias = bias.at[0, 2:2 + C].set(params['b_oh'])
    bias = bias.at[0, 2 + C:2 + 2 * C].set(params['b_ot'])

    hidden_c = hidden.astype(compute_dtype)
    w_fused_c = w_fused.astype(compute_dtype)
    w_corr_c = w_corr.astype(compute_dtype)
    shm = subj_head.reshape(B, 1, S).astype(compute_dtype)
    stm = subj_tail.reshape(B, 1, S).astype(compute_dtype)

    grid = (B, S // ts)

    # ---- pass 1: per-batch correction row (B, 1, Npad)
    corr = pl.pallas_call(
        _subject_corr_kernel,
        out_shape=jax.ShapeDtypeStruct((B, 1, n_pad), jnp.float32),
        grid_spec=pltpu.PrefetchScalarGridSpec(
            num_scalar_prefetch=0,
            grid=grid,
            in_specs=[
                pl.BlockSpec((1, 1, ts), lambda b, s: (b, 0, s)),
                pl.BlockSpec((1, 1, ts), lambda b, s: (b, 0, s)),
                pl.BlockSpec((1, ts, H), lambda b, s: (b, s, 0)),
                pl.BlockSpec((H, n_pad), lambda b, s: (0, 0)),   # stays resident
                pl.BlockSpec((1, n_pad), lambda b, s: (0, 0)),   # stays resident
            ],
            out_specs=pl.BlockSpec((1, 1, n_pad), lambda b, s: (b, 0, 0)),
            scratch_shapes=[pltpu.VMEM((1, H), jnp.float32)],
        ),
        compiler_params=pltpu.CompilerParams(
            dimension_semantics=("parallel", "arbitrary")),
    )(shm, stm, hidden_c, w_corr_c, bias)

    # ---- pass 2: fused lane-dense projection (B, S, Npad)
    fused = pl.pallas_call(
        _fused_projection_kernel,
        out_shape=jax.ShapeDtypeStruct((B, S, n_pad), jnp.float32),
        grid_spec=pltpu.PrefetchScalarGridSpec(
            num_scalar_prefetch=0,
            grid=grid,
            in_specs=[
                pl.BlockSpec((1, ts, H), lambda b, s: (b, s, 0)),
                pl.BlockSpec((H, n_pad), lambda b, s: (0, 0)),   # stays resident
                pl.BlockSpec((1, 1, n_pad), lambda b, s: (b, 0, 0)),
            ],
            out_specs=pl.BlockSpec((1, ts, n_pad), lambda b, s: (b, s, 0)),
        ),
        compiler_params=pltpu.CompilerParams(
            dimension_semantics=("parallel", "parallel")),
    )(hidden_c, w_fused_c, corr)

    # ---- split the lane-dense slab into the module's four outputs (wrapper-side)
    sh_out = fused[:, :, 0]
    st_out = fused[:, :, 1]
    oh_out = fused[:, :, 2:2 + C]
    ot_out = fused[:, :, 2 + C:2 + 2 * C]
    return sh_out, st_out, oh_out, ot_out


def make_params(key, hidden_size, num_classes):
    """Deterministic Linear-style init (uniform +/- 1/sqrt(fan_in)), PyTorch layout."""
    ks = jax.random.split(key, 8)
    bound = 1.0 / (hidden_size ** 0.5)

    def lin(kw, kb, out_f):
        w = jax.random.uniform(kw, (out_f, hidden_size), jnp.float32, -bound, bound)
        b = jax.random.uniform(kb, (out_f,), jnp.float32, -bound, bound)
        return w, b

    w_sh, b_sh = lin(ks[0], ks[1], 1)
    w_st, b_st = lin(ks[2], ks[3], 1)
    w_oh, b_oh = lin(ks[4], ks[5], num_classes)
    w_ot, b_ot = lin(ks[6], ks[7], num_classes)
    return {'w_sh': w_sh, 'b_sh': b_sh,
            'w_st': w_st, 'b_st': b_st,
            'w_oh': w_oh, 'b_oh': b_oh,
            'w_ot': w_ot, 'b_ot': b_ot}


def reference_forward(hidden, subj_head, subj_tail, params):
    """Pure-JAX mirror of the PyTorch forward, for verification."""
    sh = jnp.einsum('bsh,oh->bso', hidden, params['w_sh']) + params['b_sh']
    st = jnp.einsum('bsh,oh->bso', hidden, params['w_st']) + params['b_st']
    subj_h = jnp.matmul(subj_head[:, None, :], hidden)   # (B,1,H)
    subj_t = jnp.matmul(subj_tail[:, None, :], hidden)   # (B,1,H)
    enc = hidden + (subj_h + subj_t) / 2.0
    oh = jnp.einsum('bsh,ch->bsc', enc, params['w_oh']) + params['b_oh']
    ot = jnp.einsum('bsh,ch->bsc', enc, params['w_ot']) + params['b_ot']
    return sh[..., 0], st[..., 0], oh, ot


if __name__ == "__main__":
    B, S, H, C = 2, 8, 32, 4
    key = jax.random.PRNGKey(0)
    k_h, k_p, k_i, k_j = jax.random.split(key, 4)

    hidden = jax.random.normal(k_h, (B, S, H), dtype=jnp.float32)
    # golden subject head/tail one-hot mappings over the sequence axis
    head_idx = jax.random.randint(k_i, (B,), 0, S)
    tail_idx = jax.random.randint(k_j, (B,), 0, S)
    subj_head = jax.nn.one_hot(head_idx, S, dtype=jnp.float32)   # (B, S)
    subj_tail = jax.nn.one_hot(tail_idx, S, dtype=jnp.float32)   # (B, S)

    params = make_params(k_p, H, C)

    outs = subj_obj_span_forward(hidden, subj_head, subj_tail, params)
    outs = jax.block_until_ready(outs)

    refs = reference_forward(hidden, subj_head, subj_tail, params)
    for o, r in zip(outs, refs):
        assert o.shape == r.shape, (o.shape, r.shape)
        assert jnp.allclose(o, r, atol=1e-4, rtol=1e-4), "mismatch vs reference"

    print("KERNEL_OK")
</pallas_src>

<mosaic_0001>
module attributes {stable_mosaic.version = 11 : i64} {
  func.func @_subject_corr_kernel(%arg0: i32, %arg1: i32, %arg2: memref<1x1x8xf32, #tpu.memory_space<vmem>>, %arg3: memref<1x1x8xf32, #tpu.memory_space<vmem>>, %arg4: memref<1x8x32xf32, #tpu.memory_space<vmem>>, %arg5: memref<32x128xf32, #tpu.memory_space<vmem>>, %arg6: memref<1x128xf32, #tpu.memory_space<vmem>>, %arg7: memref<1x1x128xf32, #tpu.memory_space<vmem>>, %arg8: memref<1x32xf32, #tpu.memory_space<vmem>>) attributes {dimension_semantics = [#tpu.dimension_semantics<parallel>, #tpu.dimension_semantics<arbitrary>], iteration_bounds = array<i64: 2, 1>, scalar_prefetch = 0 : i64, scratch_operands = 1 : i64, tpu.core_type = #tpu.core_type<tc>, window_params = [{transform_indices = @transform_0, window_bounds = array<i64: 1, 1, 8>}, {transform_indices = @transform_1, window_bounds = array<i64: 1, 1, 8>}, {transform_indices = @transform_2, window_bounds = array<i64: 1, 8, 32>}, {pipeline_mode = #tpu.pipeline_mode<synchronous>, transform_indices = @transform_3, window_bounds = array<i64: 32, 128>}, {pipeline_mode = #tpu.pipeline_mode<synchronous>, transform_indices = @transform_4, window_bounds = array<i64: 1, 128>}, {transform_indices = @transform_5, window_bounds = array<i64: 1, 1, 128>}]} {
    %c0_i32 = arith.constant 0 : i32
    %0 = arith.cmpi eq, %arg1, %c0_i32 : i32
    %1 = arith.extui %0 : i1 to i32
    %c0_i32_0 = arith.constant 0 : i32
    %2 = arith.cmpi ne, %1, %c0_i32_0 : i32
    scf.if %2 {
      %cst_15 = arith.constant 0.000000e+00 : f32
      %17 = vector.broadcast %cst_15 : f32 to vector<1x32xf32>
      %c0_16 = arith.constant 0 : index
      %c0_17 = arith.constant 0 : index
      %18 = vector.load %arg8[%c0_16, %c0_17] : memref<1x32xf32, #tpu.memory_space<vmem>>, vector<1x32xf32>
      tpu.vector_store %arg8[%c0_16, %c0_17], %17 {strides = array<i32>} : memref<1x32xf32, #tpu.memory_space<vmem>>, vector<1x32xf32>,
    } else {
    }
    %c0 = arith.constant 0 : index
    %c0_1 = arith.constant 0 : index
    %c0_2 = arith.constant 0 : index
    %3 = vector.load %arg2[%c0, %c0_1, %c0_2] : memref<1x1x8xf32, #tpu.memory_space<vmem>>, vector<1x1x8xf32>
    %4 = vector.shape_cast %3 : vector<1x1x8xf32> to vector<1x8xf32>
    %c0_3 = arith.constant 0 : index
    %c0_4 = arith.constant 0 : index
    %c0_5 = arith.constant 0 : index
    %5 = vector.load %arg3[%c0_3, %c0_4, %c0_5] : memref<1x1x8xf32, #tpu.memory_space<vmem>>, vector<1x1x8xf32>
    %6 = vector.shape_cast %5 : vector<1x1x8xf32> to vector<1x8xf32>
    %7 = arith.addf %4, %6 : vector<1x8xf32>
    %c0_6 = arith.constant 0 : index
    %c0_7 = arith.constant 0 : index
    %c0_8 = arith.constant 0 : index
    %8 = vector.load %arg4[%c0_6, %c0_7, %c0_8] : memref<1x8x32xf32, #tpu.memory_space<vmem>>, vector<1x8x32xf32>
    %9 = vector.shape_cast %8 : vector<1x8x32xf32> to vector<8x32xf32>
    %c0_9 = arith.constant 0 : index
    %c0_10 = arith.constant 0 : index
    %10 = vector.load %arg8[%c0_9, %c0_10] : memref<1x32xf32, #tpu.memory_space<vmem>>, vector<1x32xf32>
    %cst = arith.constant dense<0.000000e+00> : vector<1x32xf32>
    %11 = tpu.matmul %7, %9, %cst {dimension_numbers = #tpu.dot_dimension_numbers<[1], [0], [0], [1], [0, 0, 1, 1], [], []>} : vector<1x8xf32>, vector<8x32xf32>, vector<1x32xf32> -> vector<1x32xf32>
    %12 = arith.addf %10, %11 : vector<1x32xf32>
    %c0_11 = arith.constant 0 : index
    %c0_12 = arith.constant 0 : index
    %13 = vector.load %arg8[%c0_11, %c0_12] : memref<1x32xf32, #tpu.memory_space<vmem>>, vector<1x32xf32>
    tpu.vector_store %arg8[%c0_11, %c0_12], %12 {strides = array<i32>} : memref<1x32xf32, #tpu.memory_space<vmem>>, vector<1x32xf32>,
    %c0_i32_13 = arith.constant 0 : i32
    %14 = arith.cmpi eq, %arg1, %c0_i32_13 : i32
    %15 = arith.extui %14 : i1 to i32
    %c0_i32_14 = arith.constant 0 : i32
    %16 = arith.cmpi ne, %15, %c0_i32_14 : i32
    scf.if %16 {
      %c0_15 = arith.constant 0 : index
      %c0_16 = arith.constant 0 : index
      %17 = vector.load %arg8[%c0_15, %c0_16] : memref<1x32xf32, #tpu.memory_space<vmem>>, vector<1x32xf32>
      %cst_17 = arith.constant 5.000000e-01 : f32
      %18 = vector.broadcast %cst_17 : f32 to vector<1x32xf32>
      %19 = arith.mulf %17, %18 : vector<1x32xf32>
      %c0_18 = arith.constant 0 : index
      %c0_19 = arith.constant 0 : index
      %20 = vector.load %arg5[%c0_18, %c0_19] : memref<32x128xf32, #tpu.memory_space<vmem>>, vector<32x128xf32>
      %cst_20 = arith.constant dense<0.000000e+00> : vector<1x128xf32>
      %21 = tpu.matmul %19, %20, %cst_20 {dimension_numbers = #tpu.dot_dimension_numbers<[1], [0], [0], [1], [0, 0, 1, 1], [], []>} : vector<1x32xf32>, vector<32x128xf32>, vector<1x128xf32> -> vector<1x128xf32>
      %c0_21 = arith.constant 0 : index
      %c0_22 = arith.constant 0 : index
      %22 = vector.load %arg6[%c0_21, %c0_22] : memref<1x128xf32, #tpu.memory_space<vmem>>, vector<1x128xf32>
      %23 = arith.addf %21, %22 : vector<1x128xf32>
      %c0_23 = arith.constant 0 : index
      %c0_24 = arith.constant 0 : index
      %c0_25 = arith.constant 0 : index
      %24 = vector.load %arg7[%c0_23, %c0_24, %c0_25] : memref<1x1x128xf32, #tpu.memory_space<vmem>>, vector<1x1x128xf32>
      %25 = vector.shape_cast %24 : vector<1x1x128xf32> to vector<1x128xf32>
      %26 = vector.shape_cast %23 : vector<1x128xf32> to vector<1x1x128xf32>
      tpu.vector_store %arg7[%c0_23, %c0_24, %c0_25], %26 {strides = array<i32>} : memref<1x1x128xf32, #tpu.memory_space<vmem>>, vector<1x1x128xf32>,
    } else {
    }
    return
  }
  func.func @transform_0(%arg0: i32, %arg1: i32) -> (i32, i32, i32) {
    %c0_i32 = arith.constant 0 : i32
    %c0_i32_0 = arith.constant 0 : i32
    return %arg0, %c0_i32, %arg1 : i32, i32, i32
  }
  func.func @transform_1(%arg0: i32, %arg1: i32) -> (i32, i32, i32) {
    %c0_i32 = arith.constant 0 : i32
    %c0_i32_0 = arith.constant 0 : i32
    return %arg0, %c0_i32, %arg1 : i32, i32, i32
  }
  func.func @transform_2(%arg0: i32, %arg1: i32) -> (i32, i32, i32) {
    %c0_i32 = arith.constant 0 : i32
    %c0_i32_0 = arith.constant 0 : i32
    return %arg0, %arg1, %c0_i32 : i32, i32, i32
  }
  func.func @transform_3(%arg0: i32, %arg1: i32) -> (i32, i32) {
    %c0_i32 = arith.constant 0 : i32
    %c0_i32_0 = arith.constant 0 : i32
    %c0_i32_1 = arith.constant 0 : i32
    return %c0_i32, %c0_i32_0 : i32, i32
  }
  func.func @transform_4(%arg0: i32, %arg1: i32) -> (i32, i32) {
    %c0_i32 = arith.constant 0 : i32
    %c0_i32_0 = arith.constant 0 : i32
    %c0_i32_1 = arith.constant 0 : i32
    return %c0_i32, %c0_i32_0 : i32, i32
  }
  func.func @transform_5(%arg0: i32, %arg1: i32) -> (i32, i32, i32) {
    %c0_i32 = arith.constant 0 : i32
    %c0_i32_0 = arith.constant 0 : i32
    %c0_i32_1 = arith.constant 0 : i32
    return %arg0, %c0_i32, %c0_i32_0 : i32, i32, i32
  }
}

</mosaic_0001>

<bundles_post_ra>
// kernel: tpu_custom_call.1
= control target key start
LH: loop header
LB: loop body
LE: loop exit
PB: predicated region body
PF: predicated region fallthrough
CT: control target
= control target key end

     0   :  { %s1236_s0 = inlined_call_operand.hbm [shape: f32[2,1,8], index: 0, kind: input, shape index: {}]   ;;  %s1237_s1 = inlined_call_operand.vmem [shape: f32[2,1,8], index: 1, kind: input, shape index: {}]   ;;  %s1238_s2 = inlined_call_operand.hbm [shape: f32[2,8,32], index: 2, kind: input, shape index: {}]   ;;  %s1239_s3 = inlined_call_operand.hbm [shape: f32[32,128], index: 3, kind: input, shape index: {}]   ;;  %s1240_s4 = inlined_call_operand.vmem [shape: f32[1,128], index: 4, kind: input, shape index: {}]   ;;  %s1241_s5 = inlined_call_operand.hbm [shape: f32[2,1,128], index: 5, kind: output, shape index: {}]  }
   0x1   :  { %1247 = sst [smem:[#allocation15_spill]] %s1236_s0 }
   0x2   :  { %1248 = sst [smem:[#allocation16_spill]] %s1239_s3 }
   0x3   :  { %10 = vsyncpa [#allocation4], 0 }
   0x4   :  { %12 = vsyncpa [#allocation4 + $0x1], 0 }
   0x5   :  { %13 = vsyncpa [#allocation7], 0 }
   0x6   :  { %15 = vsyncpa [#allocation7 + $0x1], 0 }
   0x7   :  { %16 = vsyncpa [#allocation5], 0 }
   0x8   :  { %18 = vsyncpa [#allocation5 + $0x1], 0  ;;  %s980_s18 = smov 0   ;;  %s982_s19 = smov 0  }
   0x9   :  { %s984_s20 = smov 0   ;;  %s986_s21 = smov 0  }
   0xa   :  { %s988_s22 = smov 0   ;;  %s990_s23 = smov 0  }
   0xb LB: > { %s1011_s24 = sadd.s32 4294967295, %s939_s23   ;;  %s634_s25 = sadd.s32 4294967294, %s939_s23   ;;  %s939_s23 = sphi %s990_s23, %s24_s23   ;;  %s935_s22 = sphi %s988_s22, %s1272_s22   ;;  %s931_s21 = sphi %s986_s21, %s1271_s21   ;;  %s927_s20 = sphi %s984_s20, %s1270_s20   ;;  %s923_s19 = sphi %s982_s19, %s1269_s19   ;;  %s919_s18 = sphi %s980_s18, %s1268_s18  }
   0xc   : > { %p58_p0 = scmp.ne.s32.totalorder %s923_s19, %s919_s18  ;;  %p1242_p1 = scmp.eq.s32.totalorder %s1011_s24, 0 }
   0xd   : > { %p186_p3 = scmp.eq.s32.totalorder %s634_s25, 1  ;;  %p635_p5 = scmp.ge.s32.totalorder %s939_s23, 1 }
   0xe   : > { %p1020_p4 = por %p1242_p1, %p58_p0  ;;  %p193_p7 = scmp.lt.s32.totalorder %s939_s23, 3 }
   0xf   : > { %p1025_p6 = por %p186_p3, %p58_p0  ;;  %s941_s29 = smov [#allocation8]  }
  0x10   : > { %s1249_s26 = scalar_select %p1020_p4, 1, 0 }
  0x11   : > { %s1250_s27 = scalar_select %p1025_p6, 1, 0 }
  0x12   : > { %p1030_p8 = pnand %p635_p5, %p193_p7  ;;  %s205_s30 = sshll.u32 %s941_s29, 4  ;;  %s206_s30 = int_to_ptr.vmem [resolvable:$true] %s205_s30 }
  0x13   : > { %s36_s7 = sadd.s32 1, %s935_s22  ;;  %s1253_s3 = sld [smem:[#allocation16_spill]] }
  0x14   : > { %s1251_s28 = scalar_select %p1030_p8, 1, 0 }
  0x15   : > { %p688_p9 = pneg %p1030_p8 }
  0x17   : > { %p1039_p11 = pnand %p688_p9, %p1242_p1 }
  0x19   : > { %s761_s10 = scalar_lea.hbm %s1253_s3, 512  ;;  %p763_p13 = pneg %p1039_p11 }
  0x1a   : > { %p762_p12 = scmp.ne.s32.totalorder %s1253_s3, %s761_s10  ;;  %p768_p5 = scmp.lt.u32.totalorder %s761_s10, %s1253_s3 }
  0x1c   : > { %p764_p0 = pnand %p763_p13, %p762_p12 }
  0x1e   : > { %p765_p3 = pneg %p764_p0 }
  0x20   : > { %p770_p7 = pnand %p768_p5, %p765_p3 }
  0x22   : > { %773 = shalt.err (!%p770_p7)
}
  0x23   : > { %s774_s15 = scalar_lea.vmem %s206_s30, 512  ;;  %p782_p2 = scmp.lt.s32.totalorder %s206_s30, %s206_s30 }
  0x24   : > { %p775_p9 = scmp.ne.s32.totalorder %s206_s30, %s774_s15  ;;  %p783_p6 = scmp.lt.s32.totalorder %s774_s15, %s774_s15 }
  0x26   : > { %p777_p10 = pnand %p775_p9, %p763_p13  ;;  %p784_p4 = por %p783_p6, %p782_p2 }
  0x28   : > { %p778_p1 = pneg %p777_p10 }
  0x2a   : > { %p785_p8 = pnand %p784_p4, %p778_p1 }
  0x2c   : > { %788 = shalt.err (!%p785_p8)
}
  0x2d   : > { %s942_s16 = smov 128   ;;  %s943_s17 = smov 8  }
  0x2e   : > { %691 = dma.hbm_to_vmem [thread:$0]  (!%p1039_p11), %s1253_s3, 512, %s206_s30, [#allocation7], %s942_s16, %s942_s16, %s943_s17  }
  0x2f   : > { %p38_p1 = scmp.ge.s32.totalorder %s36_s7, 2  ;;  %s45_s8 = sadd.s32 1, %s927_s20 }
  0x30   : > { %p52_p2 = scmp.ne.s32.totalorder %s927_s20, %s923_s19  ;;  %p53_p4 = scmp.eq.s32.totalorder %s939_s23, 0 }
  0x31   : > { %s1274_s7 = smov (%p38_p1, %s36_s7), 0  ;;  %p1255_p8 = scmp.eq.s32.totalorder %s1011_s24, 1 }
  0x32   : > { %1254 = sst [smem:[#allocation14_spill]] %s1274_s7  ;;  %p54_p6 = por %p53_p4, %p52_p2 }
  0x33   : > { %p1068_p10 = por %p1255_p8, %p52_p2  ;;  %s40_s10 = ssub.s32 %s935_s22, %s1274_s7 }
  0x34   : > { %p704_p12 = scmp.lt.s32.totalorder %s939_s23, 2  ;;  %p43_p13 = scmp.eq.s32.totalorder %s40_s10, 0 }
  0x35   : > { %s1256_s9 = scalar_select %p1068_p10, 1, 0 }
  0x36   : > { %s1076_s6 = sand.u32 1, %s927_s20   ;;  %s638_s11 = sshll.u32 %s935_s22, 4 }
  0x37   : > { %s1079_s30 = scalar_select %p43_p13, %s927_s20, %s45_s8  }
  0x38   : > { %s225_s12 = scalar_lea.vmem [#allocation3], %s1076_s6  ;;  %s1257_s0 = sld [smem:[#allocation15_spill]] }
  0x39   : > { %s233_s13 = sshll.u32 %s225_s12, 4  ;;  %p1090_p11 = pnand %p704_p12, %p54_p6  ;;  %s1088_s13 = int_to_ptr.vmem [resolvable:$true] %s233_s13 }
  0x3a   : > { %s639_s29 = sshll.u32 %s1076_s6, 3  ;;  %s223_s8 = scalar_lea.sflag [#allocation4], %s1076_s6 }
  0x3b   : > { %p791_p3 = pneg %p1090_p11 }
  0x3e   : > { %s1086_s16 = scalar_lea.hbm %s1257_s0, %s638_s11  ;;  %s794_s14 = scalar_lea.hbm %s1257_s0, 32 }
  0x3f   : > { %s789_s10 = scalar_lea.hbm %s1086_s16, 16  ;;  %p795_p9 = scmp.lt.u32.totalorder %s1086_s16, %s1257_s0 }
  0x40   : > { %p790_p0 = scmp.ne.s32.totalorder %s1086_s16, %s789_s10  ;;  %p796_p1 = scmp.lt.u32.totalorder %s794_s14, %s789_s10 }
  0x41   : > { %p798_p4 = scmp.lt.u32.totalorder %s789_s10, %s1086_s16 }
  0x42   : > { %p792_p5 = pnand %p791_p3, %p790_p0  ;;  %p797_p2 = por %p796_p1, %p795_p9 }
  0x44   : > { %p793_p7 = pneg %p792_p5  ;;  %p799_p6 = por %p798_p4, %p797_p2 }
  0x46   : > { %p800_p8 = pnand %p799_p6, %p793_p7 }
  0x48   : > { %803 = shalt.err (!%p800_p8)
}
  0x49   : > { %s804_s25 = scalar_lea.vmem %s1088_s13, 16  ;;  %s944_s11 = smov [#allocation3]  }
  0x4a   : > { %p805_p12 = scmp.ne.s32.totalorder %s1088_s13, %s804_s25  ;;  %s809_s12 = sshll.u32 %s944_s11, 4  ;;  %s810_s12 = int_to_ptr.vmem [resolvable:$false] %s809_s12 }
  0x4b   : > { %s811_s3 = scalar_lea.vmem %s810_s12, 32  ;;  %p812_p5 = scmp.lt.s32.totalorder %s1088_s13, %s810_s12 }
  0x4c   : > { %p807_p13 = pnand %p805_p12, %p791_p3  ;;  %p813_p9 = scmp.lt.s32.totalorder %s811_s3, %s804_s25 }
  0x4e   : > { %p808_p0 = pneg %p807_p13  ;;  %p814_p1 = por %p813_p9, %p812_p5 }
  0x50   : > { %p815_p2 = pnand %p814_p1, %p808_p0 }
  0x52   : > { %818 = shalt.err (!%p815_p2)
}
  0x53   : > { %695 = dma.hbm_to_vmem [thread:$0]  (!%p1090_p11), %s1086_s16, 16, %s1088_s13, %s223_s8  }
  0x54   : > { %s640_s10 = sshll.u32 %s935_s22, 7  ;;  %s253_s14 = scalar_lea.vmem [#allocation6], %s639_s29 }
  0x55   : > { %s261_s15 = sshll.u32 %s253_s14, 4  ;;  %s1128_s25 = scalar_lea.hbm %s1238_s2, %s640_s10  ;;  %s262_s15 = int_to_ptr.vmem [resolvable:$true] %s261_s15 }
  0x56   : > { %s1259_s12 = sand.u32 1, %s939_s23   ;;  %s819_s7 = scalar_lea.hbm %s1128_s25, 128 }
  0x57   : > { %s250_s3 = scalar_lea.sflag [#allocation7], %s1259_s12  ;;  %p820_p7 = scmp.ne.s32.totalorder %s1128_s25, %s819_s7 }
  0x58   : > { %s824_s16 = scalar_lea.hbm %s1238_s2, 256  ;;  %p825_p8 = scmp.lt.u32.totalorder %s1128_s25, %s1238_s2 }
  0x59   : > { %p822_p4 = pnand %p820_p7, %p791_p3  ;;  %p826_p12 = scmp.lt.u32.totalorder %s824_s16, %s819_s7 }
  0x5a   : > { %p828_p0 = scmp.lt.u32.totalorder %s819_s7, %s1128_s25 }
  0x5b   : > { %p823_p6 = pneg %p822_p4  ;;  %p827_p13 = por %p826_p12, %p825_p8 }
  0x5d   : > { %p829_p5 = por %p828_p0, %p827_p13 }
  0x5f   : > { %p830_p9 = pnand %p829_p5, %p823_p6 }
  0x61   : > { %833 = shalt.err (!%p830_p9)
}
  0x62   : > { %s834_s8 = scalar_lea.vmem %s262_s15, 128  ;;  %s945_s10 = smov [#allocation6]  }
  0x63   : > { %p835_p1 = scmp.ne.s32.totalorder %s262_s15, %s834_s8  ;;  %s839_s14 = sshll.u32 %s945_s10, 4  ;;  %s840_s14 = int_to_ptr.vmem [resolvable:$false] %s839_s14 }
  0x64   : > { %s841_s11 = scalar_lea.vmem %s840_s14, 256  ;;  %p842_p4 = scmp.lt.s32.totalorder %s262_s15, %s840_s14 }
  0x65   : > { %p837_p2 = pnand %p835_p1, %p791_p3  ;;  %p843_p10 = scmp.lt.s32.totalorder %s841_s11, %s834_s8 }
  0x67   : > { %p838_p7 = pneg %p837_p2  ;;  %p844_p8 = por %p843_p10, %p842_p4 }
  0x69   : > { %p845_p12 = pnand %p844_p8, %p838_p7 }
  0x6b   : > { %848 = shalt.err (!%p845_p12)
}
  0x6c   : > { %698 = dma.hbm_to_vmem [thread:$0]  (!%p1090_p11), %s1128_s25, 128, %s262_s15, %s250_s3  }
  0x6d   : > { %p1260_p6 = scmp.ne.s32.totalorder %s1251_s28, 0 }
  0x6e   : > { %s1154_s7 = sand.u32 (!%p1260_p6), 1, %s923_s19   ;;  %p1261_p3 = scmp.ne.s32.totalorder (!%p1260_p6), %s1249_s26, 0 }
  0x6f   : > { %270 = sbr.rel (%p1260_p6) target bundleno = 585 (0x249), region = 40  ;;  %s273_s12 = scalar_lea.sflag (!%p1260_p6), [#allocation4], %s1154_s7 }
  0x70   : > { %s275_s6 = scalar_lea.vmem (!%p1260_p6), [#allocation3], %s1154_s7 }
  0x76   : > { %902 = dma.done.wait (%p1261_p3), %s273_s12, 16  }
  0x77   : > { %904 = vsyncadd (%p1261_p3), %s273_s12, 4294967280  ;;  %s280_s17 = sand.u32 1, %s1011_s24   ;;  %s642_s15 = sshll.u32 %s1154_s7, 3 }
  0x78   : > { %s281_s28 = scalar_lea.sflag [#allocation7], %s280_s17  ;;  %s284_s25 = scalar_lea.vmem [#allocation6], %s642_s15 }
  0x79   : > { %906 = dma.done.wait (%p1261_p3), %s281_s28, 128  }
  0x7a   : > { %908 = vsyncadd (%p1261_p3), %s281_s28, 4294967168  ;;  %p1262_p10 = scmp.eq.s32.totalorder %s1011_s24, 0 }
  0x7c   : > { %910 = dma.done.wait (%p1262_p10), [#allocation7], 512   ;;  %p1263_p11 = pmov %p1262_p10 }
  0x7d   : > { %vm334_vm0 = vcmask 253952   ;;  %p324_p13 = scmp.lt.s32.totalorder %s931_s21, 1  ;;  %v946_v0 = vmov 0.0   ;;  %vm947_vm1 = vmmov 0   ;;  %v339_v1 = vld [vmem:[%s284_s25] sm:$0xff]  ;;  %vm341_vm2 = vcmask 64512  }
  0x7e   : > { %912 = vsyncadd (%p1263_p11), [#allocation7], 4294966784  ;;  %335 = vst.msk [vmem:[#allocation2] sm:$0x1] %vm334_vm0, %v946_v0  ;;  %656 = vmatprep.subr.mxu0 %v946_v0  ;;  %658 = vmatprep.mubr.msk.f32.mxu0 %vm947_vm1, %v946_v0  ;;  %v336_v2 = vld [vmem:[%s275_s6] sm:$0x1] }
  0x7f   : > { %s325_s3 = scalar_select %p324_p13, %s931_s21, 1  ;;  %669 = vmatprep.mubr.msk.f32.mxu1 %vm947_vm1, %v946_v0  ;;  %657 = vmatpush3.msra.mxu0 %v339_v1  ;;  %v423_v5 = vld [vmem:[#allocation8] sm:$0xff]  ;;  %v424_v6 = vld [vmem:[#allocation8 + $0x8] sm:$0xff]  ;;  %v425_v7 = vld [vmem:[#allocation8 + $0x10] sm:$0xff]  ;;  %v948_v8 = vmov 0.0|0.0   ;;  %vm428_vm3 = vcmask 261120  }
  0x80   : > { %672 = vmatprep.subr.bf16.mxu1 %v948_v8  ;;  %v673_v9 = vpack.c.bf16 %v424_v6, %v423_v5  ;;  %v426_v10 = vld [vmem:[#allocation8 + $0x18] sm:$0xff]  ;;  %v427_v18 = vld [vmem:[%s1240_s4] sm:$0x1]  ;;  %s646_s29 = sshll.u32 %s931_s21, 4  ;;  %s323_s8 = scalar_lea.vmem [#allocation9], %s1154_s7 }
  0x81   : > { %s329_s16 = scalar_lea.vmem %s1237_s1, %s325_s3  ;;  %v676_v11 = vpack.c.bf16 %v426_v10, %v425_v7  ;;  %s516_s10 = sshll.u32 %s323_s8, 4  ;;  %s1189_s10 = int_to_ptr.vmem [resolvable:$true] %s516_s10 }
  0x82   : > { %v337_v3 = vld [vmem:[%s329_s16] sm:$0x1]  ;;  %674 = vmatpush3.bf16.msra.mxu1 %v673_v9  ;;  %s1187_s12 = scalar_lea.hbm %s1241_s5, %s646_s29  ;;  %s504_s6 = scalar_lea.sflag [#allocation5], %s1154_s7 }
  0x83   : > { %v338_v4 = vadd.f32 %v337_v3, %v336_v2  ;;  %675 = vmatprep.subr.bf16.mxu1 %v948_v8  ;;  %s849_s17 = scalar_lea.vmem %s1189_s10, 16  ;;  %p1264_p5 = scmp.ne.s32.totalorder %s1256_s9, 0 }
  0x84   : > { %p850_p0 = scmp.ne.s32.totalorder %s1189_s10, %s849_s17  ;;  %s949_s21 = smov [#allocation9]  }
  0x85   : > { %659 = vmatmul.mubr.msk.f32.vlgmr.msra.gmra.mrb[0].mxu0 %vm341_vm2, %v338_v4  ;;  %v340_v12 = vld [vmem:[#allocation2] sm:$0x1]  ;;  %s853_s15 = sshll.u32 %s949_s21, 4  ;;  %s854_s15 = int_to_ptr.vmem [resolvable:$false] %s853_s15 }
  0x86   : > { %677 = vmatpush3.bf16.msra.mxu1 %v676_v11  ;;  %p851_p9 = pnand %p850_p0, %p1264_p5  ;;  %s855_s28 = scalar_lea.vmem %s854_s15, 32 }
  0x87   : > { %p856_p2 = scmp.lt.s32.totalorder %s1189_s10, %s854_s15  ;;  %p857_p7 = scmp.lt.s32.totalorder %s855_s28, %s849_s17 }
  0x88   : > { %p852_p1 = pneg %p851_p9 }
  0x89   : > { %p858_p4 = por %p857_p7, %p856_p2 }
  0x8b   : > { %p859_p8 = pnand %p858_p4, %p852_p1 }
 0x158   : > { %v411_v13 = vpop.f32.mrb[0].mxu0 }
 0x159   : > { %v415_v14 = vadd.f32 %v411_v13, %v340_v12  ;;  %v660_v15 = vpop.f32.mrb[1].mxu0 }
 0x15b   : > { %417 = vst.msk [vmem:[#allocation2] sm:$0x1] %vm334_vm0, %v415_v14 }
 0x162   : > { %v421_v16 = vld [vmem:[#allocation2] sm:$0x1] }
 0x163   : > { %v422_v17 = vmul.f32 0.5, %v421_v16 }
 0x165   : > { %670 = vmatmul.mubr.msk.f32.vlgmr.msra.gmra.mrb[0].mxu1 %vm428_vm3, %v422_v17 }
 0x238   : > { %v498_v19 = vpop.f32.mrb[0].mxu1 }
 0x239   : > { %v499_v20 = vadd.f32 %v498_v19, %v427_v18  ;;  %v671_v21 = vpop.f32.mrb[1].mxu1 }
 0x23b   : > { %502 = vst [vmem:[%s323_s8] sm:$0x1] %v499_v20 }
 0x23c   : > { %862 = shalt.err (!%p859_p8)
}
 0x23d   : > { %s863_s7 = scalar_lea.hbm %s1187_s12, 16  ;;  %s867_s26 = scalar_lea.hbm %s1241_s5, 32 }
 0x23e   : > { %p864_p12 = scmp.ne.s32.totalorder %s1187_s12, %s863_s7  ;;  %p868_p10 = scmp.lt.u32.totalorder %s1187_s12, %s1241_s5 }
 0x23f   : > { %p869_p11 = scmp.lt.u32.totalorder %s867_s26, %s863_s7  ;;  %p871_p0 = scmp.lt.u32.totalorder %s863_s7, %s1187_s12 }
 0x240   : > { %p865_p6 = pnand %p864_p12, %p1264_p5 }
 0x241   : > { %p870_p13 = por %p869_p11, %p868_p10 }
 0x242   : > { %p866_p3 = pneg %p865_p6 }
 0x243   : > { %p872_p9 = por %p871_p0, %p870_p13 }
 0x245   : > { %p873_p1 = pnand %p872_p9, %p866_p3 }
 0x247   : > { %876 = shalt.err (!%p873_p1)
}
 0x248   : > { %686 = dma.vmem_to_hbm [thread:$0]  (%p1264_p5), %s1189_s10, 16, %s1187_s12, %s504_s6  }
 0x249 PF: > { %s528_s24 = sand.u32 1, %s919_s18   ;;  %p1265_p2 = scmp.ne.s32.totalorder %s1250_s27, 0 }
 0x24a   : > { %p1266_p7 = scmp.ge.s32.totalorder %s939_s23, 2  ;;  %s529_s0 = scalar_lea.sflag [#allocation5], %s528_s24 }
 0x24c   : > { %p700_p4 = pnand %p1266_p7, %p1265_p2 }
 0x24e   : > { %914 = dma.done.wait (!%p700_p4), %s529_s0, 16  }
 0x24f   : > { %916 = vsyncadd (!%p700_p4), %s529_s0, 4294967280  ;;  %s24_s23 = sadd.s32 1, %s939_s23   ;;  %s1267_s9 = sld [smem:[#allocation14_spill]] }
 0x250   : > { %p21_p8 = scmp.ge.s32.totalorder %s24_s23, 4   ;;  %s1268_s18 = smov %s923_s19 }
 0x251   : > { %s1269_s19 = smov %s927_s20  ;;  %s1270_s20 = smov %s1079_s30 }
 0x252   : > { %s1271_s21 = smov %s935_s22  ;;  %23 = sbr.rel (!%p21_p8) target bundleno = 11 (0xb), region = 113 }
 0x255   : > { %s1272_s22 = smov %s1267_s9 }
 0x259   :  { %533 = vsyncpa [#allocation4], 1 }
 0x25a   :  { %535 = vsyncpa [#allocation4 + $0x1], 1 }
 0x25b   :  { %536 = vsyncpa [#allocation7], 1 }
 0x25c   :  { %538 = vsyncpa [#allocation7 + $0x1], 1 }
 0x25d   :  { %539 = vsyncpa [#allocation5], 1 }
 0x25e   :  { %541 = vsyncpa [#allocation5 + $0x1], 1 }

</bundles_post_ra>
